<compile_context>
chip_gen: v7x
topology: tpu7x:2x2x1
jax: 0.10.0
libtpu: 0.0.40
codegen_flags: <defaults>
</compile_context>

<pallas_src>
import functools

import jax
import jax.numpy as jnp
from jax.experimental import pallas as pl
from jax.experimental.pallas import tpu as pltpu


def textcnn_kernel(mask_ref, pool_ref, x_ref, w_ref, o_ref, xpad_ref, *,
                   num_layers, kernel_size, pad, lanes):
    # mask_ref: (1, lanes)         f32, 1.0 at valid (non-pad) packed columns
    # pool_ref: (lanes, TB)        f32, per-segment mean matrix (1/L at valid cols)
    # x_ref:    (1, C, lanes)      packed activations for TB batch elements
    # w_ref:    (NL, C, K*C + 1)   merged conv weights, bias in the last column
    # o_ref:    (1, C, TB)         pooled output for this batch group
    # xpad_ref: (C, lanes + 2*pad) persistent VMEM scratch (halo columns stay 0)
    C = x_ref.shape[1]
    x = x_ref[0]                                       # (C, lanes) f32
    valid = mask_ref[...] > 0.5                        # (1, lanes), bcast over C
    ones_row = jnp.ones((1, lanes), jnp.float32)       # bias "tap" for merged matmul

    # Zero the scratch once per grid step; the 2*pad halo columns stay 0 forever.
    xpad_ref[...] = jnp.zeros(xpad_ref.shape, jnp.float32)

    # num_layers is small here; switch to lax.fori_loop if depth grows large.
    for layer in range(num_layers):
        xpad_ref[:, pad:pad + lanes] = x               # one store per layer
        taps = [xpad_ref[:, k:k + lanes] for k in range(kernel_size)]
        rhs = jnp.concatenate(taps + [ones_row], axis=0)        # (K*C + 1, lanes)
        y = jnp.dot(w_ref[layer], rhs,
                    preferred_element_type=jnp.float32)         # conv + bias
        # Residual + tanh; re-zero pad columns so segments never leak across.
        x = jnp.where(valid, x + jnp.tanh(y), 0.0)

    # avg_pool1d(kernel=L): per-segment mean via one more MXU matmul -> (C, TB).
    o_ref[0] = jnp.dot(x, pool_ref[...], preferred_element_type=jnp.float32)


def textcnn_forward(x, weights, biases, kernel_size, *, batch_tile=8):
    """x: (B, C, L); weights: (NL, C_out, C_in, K); biases: (NL, C) -> (B, C)."""
    B, C, L = x.shape
    num_layers = weights.shape[0]
    K = kernel_size
    pad = K - 2
    # The residual x + tanh(conv(x)) only type-checks when the conv preserves length.
    assert L + 2 * pad - K + 1 == L, "residual add requires kernel_size == 3"
    tb = min(batch_tile, B)
    assert B % tb == 0, "batch must be divisible by batch_tile"
    G = B // tb
    Lp = L + 2 * pad
    lanes = tb * Lp

    # --- one-time glue in the wrapper (cheap XLA ops) -------------------------
    xf = x.astype(jnp.float32)
    xp = jnp.pad(xf, ((0, 0), (0, 0), (pad, pad)))                  # (B, C, Lp)
    x_packed = xp.reshape(G, tb, C, Lp).transpose(0, 2, 1, 3).reshape(G, C, lanes)

    # Merged weights (NL, C_out, K*C_in) with bias appended as the last column.
    w_m = jnp.transpose(weights.astype(jnp.float32), (0, 1, 3, 2)).reshape(
        num_layers, C, K * C)
    w_m = jnp.concatenate(
        [w_m, biases.astype(jnp.float32)[:, :, None]], axis=-1)    # (NL, C, K*C+1)

    # Valid-column mask and per-segment mean matrix for the packed lane axis.
    col = jnp.arange(lanes)
    pos = col % Lp
    valid = (pos >= pad) & (pos < pad + L)
    mask = valid.astype(jnp.float32)[None, :]                        # (1, lanes)
    seg = col // Lp
    pool = (valid[:, None] & (seg[:, None] == jnp.arange(tb)[None, :])
            ).astype(jnp.float32) / L                                # (lanes, TB)

    kern = functools.partial(textcnn_kernel, num_layers=num_layers,
                             kernel_size=K, pad=pad, lanes=lanes)

    out = pl.pallas_call(
        kern,
        out_shape=jax.ShapeDtypeStruct((G, C, tb), jnp.float32),
        grid_spec=pltpu.PrefetchScalarGridSpec(
            num_scalar_prefetch=0,
            grid=(G,),
            in_specs=[
                pl.BlockSpec((1, lanes), lambda g: (0, 0)),
                pl.BlockSpec((lanes, tb), lambda g: (0, 0)),
                pl.BlockSpec((1, C, lanes), lambda g: (g, 0, 0)),
                pl.BlockSpec((num_layers, C, K * C + 1), lambda g: (0, 0, 0)),
            ],
            out_specs=pl.BlockSpec((1, C, tb), lambda g: (g, 0, 0)),
            scratch_shapes=[pltpu.VMEM((C, lanes + 2 * pad), jnp.float32)],
        ),
        # For very large C / num_layers (v7x: 64 MiB VMEM), additionally set
        # vmem_limit_bytes and tile the layer axis instead of keeping all
        # weights resident.
        compiler_params=pltpu.CompilerParams(dimension_semantics=("parallel",)),
    )(mask, pool, x_packed, w_m)

    # (G, C, TB) -> (B, C)
    return out.transpose(0, 2, 1).reshape(B, C)


def textcnn_reference(x, weights, biases, kernel_size):
    """Pure-JAX reference mirroring the PyTorch forward."""
    pad = kernel_size - 2
    num_layers = weights.shape[0]
    for layer in range(num_layers):
        y = jax.lax.conv_general_dilated(
            x, weights[layer], window_strides=(1,), padding=[(pad, pad)],
            dimension_numbers=("NCH", "OIH", "NCH"),
        ) + biases[layer][None, :, None]
        x = x + jnp.tanh(y)
    return jnp.mean(x, axis=-1)


if __name__ == "__main__":
    # Small shapes consistent with the module: x is (batch, max_len, length).
    batch = 16          # folded 8-at-a-time onto the lane axis -> grid of 2 steps
    max_len = 32        # channel count of every Conv1d (in == out == max_len)
    length = 14         # Lp = length + 2 = 16, so 8 * 16 = 128 packed lanes
    num_layers = 2
    kernel_size = 3     # only value for which the residual add is shape-consistent

    key = jax.random.PRNGKey(0)
    kx, kw, kb = jax.random.split(key, 3)

    x = jax.random.normal(kx, (batch, max_len, length), jnp.float32)
    # PyTorch Conv1d parameter shapes: (C_out, C_in, K) and (C_out,) per layer.
    weights = jax.random.normal(
        kw, (num_layers, max_len, max_len, kernel_size), jnp.float32
    ) * (1.0 / (max_len * kernel_size) ** 0.5)
    biases = jax.random.normal(kb, (num_layers, max_len), jnp.float32) * 0.1

    out = textcnn_forward(x, weights, biases, kernel_size, batch_tile=8)
    out = jax.block_until_ready(out)

    ref = textcnn_reference(x, weights, biases, kernel_size)
    assert out.shape == (batch, max_len)
    max_err = jnp.max(jnp.abs(out - ref))
    assert jnp.allclose(out, ref, atol=1e-4, rtol=1e-4), f"max abs err = {max_err}"

    print("KERNEL_OK")
</pallas_src>

<mosaic_0001>
module attributes {stable_mosaic.version = 11 : i64} {
  func.func @textcnn_kernel(%arg0: i32, %arg1: memref<1x128xf32, #tpu.memory_space<vmem>>, %arg2: memref<128x8xf32, #tpu.memory_space<vmem>>, %arg3: memref<1x32x128xf32, #tpu.memory_space<vmem>>, %arg4: memref<2x32x97xf32, #tpu.memory_space<vmem>>, %arg5: memref<1x32x8xf32, #tpu.memory_space<vmem>>, %arg6: memref<32x130xf32, #tpu.memory_space<vmem>>) attributes {dimension_semantics = [#tpu.dimension_semantics<parallel>], iteration_bounds = array<i64: 2>, scalar_prefetch = 0 : i64, scratch_operands = 1 : i64, tpu.core_type = #tpu.core_type<tc>, window_params = [{pipeline_mode = #tpu.pipeline_mode<synchronous>, transform_indices = @transform_0, window_bounds = array<i64: 1, 128>}, {pipeline_mode = #tpu.pipeline_mode<synchronous>, transform_indices = @transform_1, window_bounds = array<i64: 128, 8>}, {transform_indices = @transform_2, window_bounds = array<i64: 1, 32, 128>}, {pipeline_mode = #tpu.pipeline_mode<synchronous>, transform_indices = @transform_3, window_bounds = array<i64: 2, 32, 97>}, {transform_indices = @transform_4, window_bounds = array<i64: 1, 32, 8>}]} {
    %c0 = arith.constant 0 : index
    %c0_0 = arith.constant 0 : index
    %c0_1 = arith.constant 0 : index
    %0 = vector.load %arg3[%c0, %c0_0, %c0_1] : memref<1x32x128xf32, #tpu.memory_space<vmem>>, vector<1x32x128xf32>
    %1 = vector.shape_cast %0 : vector<1x32x128xf32> to vector<32x128xf32>
    %c0_2 = arith.constant 0 : index
    %c0_3 = arith.constant 0 : index
    %2 = vector.load %arg1[%c0_2, %c0_3] : memref<1x128xf32, #tpu.memory_space<vmem>>, vector<1x128xf32>
    %cst = arith.constant 5.000000e-01 : f32
    %3 = vector.broadcast %cst : f32 to vector<1x128xf32>
    %4 = arith.cmpf ogt, %2, %3 : vector<1x128xf32>
    %cst_4 = arith.constant 1.000000e+00 : f32
    %5 = vector.broadcast %cst_4 : f32 to vector<1x128xf32>
    %cst_5 = arith.constant 0.000000e+00 : f32
    %6 = vector.broadcast %cst_5 : f32 to vector<32x130xf32>
    %c0_6 = arith.constant 0 : index
    %c0_7 = arith.constant 0 : index
    %7 = vector.load %arg6[%c0_6, %c0_7] : memref<32x130xf32, #tpu.memory_space<vmem>>, vector<32x130xf32>
    tpu.vector_store %arg6[%c0_6, %c0_7], %6 {strides = array<i32>} : memref<32x130xf32, #tpu.memory_space<vmem>>, vector<32x130xf32>,
    %c0_8 = arith.constant 0 : index
    %c1 = arith.constant 1 : index
    %8 = vector.load %arg6[%c0_8, %c1] : memref<32x130xf32, #tpu.memory_space<vmem>>, vector<32x128xf32>
    tpu.vector_store %arg6[%c0_8, %c1], %1 {strides = array<i32>} : memref<32x130xf32, #tpu.memory_space<vmem>>, vector<32x128xf32>,
    %c0_9 = arith.constant 0 : index
    %c0_10 = arith.constant 0 : index
    %9 = vector.load %arg6[%c0_9, %c0_10] : memref<32x130xf32, #tpu.memory_space<vmem>>, vector<32x128xf32>
    %c0_11 = arith.constant 0 : index
    %c1_12 = arith.constant 1 : index
    %10 = vector.load %arg6[%c0_11, %c1_12] : memref<32x130xf32, #tpu.memory_space<vmem>>, vector<32x128xf32>
    %c0_13 = arith.constant 0 : index
    %c2 = arith.constant 2 : index
    %11 = vector.load %arg6[%c0_13, %c2] : memref<32x130xf32, #tpu.memory_space<vmem>>, vector<32x128xf32>
    %12 = tpu.concatenate %9, %10, %11, %5 in 0 : vector<32x128xf32>, vector<32x128xf32>, vector<32x128xf32>, vector<1x128xf32> -> vector<97x128xf32>
    %c0_14 = arith.constant 0 : index
    %c0_15 = arith.constant 0 : index
    %c0_16 = arith.constant 0 : index
    %13 = vector.load %arg4[%c0_14, %c0_15, %c0_16] : memref<2x32x97xf32, #tpu.memory_space<vmem>>, vector<1x32x97xf32>
    %14 = vector.shape_cast %13 : vector<1x32x97xf32> to vector<32x97xf32>
    %cst_17 = arith.constant dense<0.000000e+00> : vector<32x128xf32>
    %15 = tpu.matmul %14, %12, %cst_17 {dimension_numbers = #tpu.dot_dimension_numbers<[1], [0], [0], [1], [0, 0, 1, 1], [], []>} : vector<32x97xf32>, vector<97x128xf32>, vector<32x128xf32> -> vector<32x128xf32>
    %16 = math.tanh %15 : vector<32x128xf32>
    %17 = arith.addf %1, %16 : vector<32x128xf32>
    %cst_18 = arith.constant 0.000000e+00 : f32
    %18 = vector.shape_cast %4 : vector<1x128xi1> to vector<1x128xi1>
    %19 = vector.broadcast %18 : vector<1x128xi1> to vector<32x128xi1>
    %20 = vector.broadcast %cst_18 : f32 to vector<32x128xf32>
    %21 = arith.select %19, %17, %20 : vector<32x128xi1>, vector<32x128xf32>
    %c0_19 = arith.constant 0 : index
    %c1_20 = arith.constant 1 : index
    %22 = vector.load %arg6[%c0_19, %c1_20] : memref<32x130xf32, #tpu.memory_space<vmem>>, vector<32x128xf32>
    tpu.vector_store %arg6[%c0_19, %c1_20], %21 {strides = array<i32>} : memref<32x130xf32, #tpu.memory_space<vmem>>, vector<32x128xf32>,
    %c0_21 = arith.constant 0 : index
    %c0_22 = arith.constant 0 : index
    %23 = vector.load %arg6[%c0_21, %c0_22] : memref<32x130xf32, #tpu.memory_space<vmem>>, vector<32x128xf32>
    %c0_23 = arith.constant 0 : index
    %c1_24 = arith.constant 1 : index
    %24 = vector.load %arg6[%c0_23, %c1_24] : memref<32x130xf32, #tpu.memory_space<vmem>>, vector<32x128xf32>
    %c0_25 = arith.constant 0 : index
    %c2_26 = arith.constant 2 : index
    %25 = vector.load %arg6[%c0_25, %c2_26] : memref<32x130xf32, #tpu.memory_space<vmem>>, vector<32x128xf32>
    %26 = tpu.concatenate %23, %24, %25, %5 in 0 : vector<32x128xf32>, vector<32x128xf32>, vector<32x128xf32>, vector<1x128xf32> -> vector<97x128xf32>
    %c1_27 = arith.constant 1 : index
    %c0_28 = arith.constant 0 : index
    %c0_29 = arith.constant 0 : index
    %27 = vector.load %arg4[%c1_27, %c0_28, %c0_29] : memref<2x32x97xf32, #tpu.memory_space<vmem>>, vector<1x32x97xf32>
    %28 = vector.shape_cast %27 : vector<1x32x97xf32> to vector<32x97xf32>
    %cst_30 = arith.constant dense<0.000000e+00> : vector<32x128xf32>
    %29 = tpu.matmul %28, %26, %cst_30 {dimension_numbers = #tpu.dot_dimension_numbers<[1], [0], [0], [1], [0, 0, 1, 1], [], []>} : vector<32x97xf32>, vector<97x128xf32>, vector<32x128xf32> -> vector<32x128xf32>
    %30 = math.tanh %29 : vector<32x128xf32>
    %31 = arith.addf %21, %30 : vector<32x128xf32>
    %cst_31 = arith.constant 0.000000e+00 : f32
    %32 = vector.shape_cast %4 : vector<1x128xi1> to vector<1x128xi1>
    %33 = vector.broadcast %32 : vector<1x128xi1> to vector<32x128xi1>
    %34 = vector.broadcast %cst_31 : f32 to vector<32x128xf32>
    %35 = arith.select %33, %31, %34 : vector<32x128xi1>, vector<32x128xf32>
    %c0_32 = arith.constant 0 : index
    %c0_33 = arith.constant 0 : index
    %36 = vector.load %arg2[%c0_32, %c0_33] : memref<128x8xf32, #tpu.memory_space<vmem>>, vector<128x8xf32>
    %cst_34 = arith.constant dense<0.000000e+00> : vector<32x8xf32>
    %37 = tpu.matmul %35, %36, %cst_34 {dimension_numbers = #tpu.dot_dimension_numbers<[1], [0], [0], [1], [0, 0, 1, 1], [], []>} : vector<32x128xf32>, vector<128x8xf32>, vector<32x8xf32> -> vector<32x8xf32>
    %c0_35 = arith.constant 0 : index
    %c0_36 = arith.constant 0 : index
    %c0_37 = arith.constant 0 : index
    %38 = vector.load %arg5[%c0_35, %c0_36, %c0_37] : memref<1x32x8xf32, #tpu.memory_space<vmem>>, vector<1x32x8xf32>
    %39 = vector.shape_cast %38 : vector<1x32x8xf32> to vector<32x8xf32>
    %40 = vector.shape_cast %37 : vector<32x8xf32> to vector<1x32x8xf32>
    tpu.vector_store %arg5[%c0_35, %c0_36, %c0_37], %40 {strides = array<i32>} : memref<1x32x8xf32, #tpu.memory_space<vmem>>, vector<1x32x8xf32>,
    return
  }
  func.func @transform_0(%arg0: i32) -> (i32, i32) {
    %c0_i32 = arith.constant 0 : i32
    %c0_i32_0 = arith.constant 0 : i32
    %c0_i32_1 = arith.constant 0 : i32
    return %c0_i32, %c0_i32_0 : i32, i32
  }
  func.func @transform_1(%arg0: i32) -> (i32, i32) {
    %c0_i32 = arith.constant 0 : i32
    %c0_i32_0 = arith.constant 0 : i32
    %c0_i32_1 = arith.constant 0 : i32
    return %c0_i32, %c0_i32_0 : i32, i32
  }
  func.func @transform_2(%arg0: i32) -> (i32, i32, i32) {
    %c0_i32 = arith.constant 0 : i32
    %c0_i32_0 = arith.constant 0 : i32
    %c0_i32_1 = arith.constant 0 : i32
    return %arg0, %c0_i32, %c0_i32_0 : i32, i32, i32
  }
  func.func @transform_3(%arg0: i32) -> (i32, i32, i32) {
    %c0_i32 = arith.constant 0 : i32
    %c0_i32_0 = arith.constant 0 : i32
    %c0_i32_1 = arith.constant 0 : i32
    %c0_i32_2 = arith.constant 0 : i32
    return %c0_i32, %c0_i32_0, %c0_i32_1 : i32, i32, i32
  }
  func.func @transform_4(%arg0: i32) -> (i32, i32, i32) {
    %c0_i32 = arith.constant 0 : i32
    %c0_i32_0 = arith.constant 0 : i32
    %c0_i32_1 = arith.constant 0 : i32
    return %arg0, %c0_i32, %c0_i32_0 : i32, i32, i32
  }
}

</mosaic_0001>

<bundles_post_ra>
// kernel: tpu_custom_call.1
= control target key start
LH: loop header
LB: loop body
LE: loop exit
PB: predicated region body
PF: predicated region fallthrough
CT: control target
= control target key end

     0   :  { %s1208_s15 = smov 0   ;;  %s1430_s0 = inlined_call_operand.vmem [shape: f32[1,128], index: 0, kind: input, shape index: {}]   ;;  %s1431_s1 = inlined_call_operand.vmem [shape: f32[128,8], index: 1, kind: input, shape index: {}]   ;;  %s1432_s2 = inlined_call_operand.vmem [shape: f32[2,32,128], index: 2, kind: input, shape index: {}]   ;;  %s1433_s3 = inlined_call_operand.vmem [shape: f32[2,32,97], index: 3, kind: input, shape index: {}]   ;;  %s1434_s4 = inlined_call_operand.vmem [shape: f32[2,32,8], index: 4, kind: output, shape index: {}]  }
   0x1 LB: > { %s792_s16 = sadd.s32 4294967295, %s1175_s15   ;;  %p796_p0 = scmp.ge.s32.totalorder %s1175_s15, 1  ;;  %s1175_s15 = sphi %s1208_s15, %s14_s15  }
   0x2   : > { %p162_p1 = scmp.lt.s32.totalorder %s1175_s15, 3 }
   0x4   : > { %p163_p2 = pnand %p796_p0, %p162_p1 }
   0x5   : > { %p188_p3 = scmp.lt.s32.totalorder (!%p163_p2), %s792_s16, 1  ;;  %vm205_vm0 = vcmask (!%p163_p2), 15360   ;;  %v1177_v0 = vmov (!%p163_p2), 0.0   ;;  %s1178_s21 = smov (!%p163_p2), 1   ;;  %vm229_vm1 = vcmask (!%p163_p2), 1047560   ;;  %vm231_vm2 = vcmask (!%p163_p2), 7168  }
   0x6   : > { %166 = sbr.rel (%p163_p2) target bundleno = 1221 (0x4c5), region = 36  ;;  %209 = vst [vmem:[#allocation2 + $0x20] sm:$0xff] (!%p163_p2), %v1177_v0  ;;  %210 = vst.msk [vmem:[#allocation2 + $0x28] sm:$0xff] (!%p163_p2), %vm205_vm0, %v1177_v0  ;;  %s1179_s22 = smov (!%p163_p2), 127   ;;  %v305_v23 = vld [vmem:[%s1433_s3] sm:$0xff] (!%p163_p2)  ;;  %vm309_vm3 = vcmask (!%p163_p2), 793600  }
   0x7   : > { %204 = vst [vmem:[#allocation2] sm:$0xff] (!%p163_p2), %v1177_v0  ;;  %206 = vst.msk [vmem:[#allocation2 + $0x8] sm:$0xff] (!%p163_p2), %vm205_vm0, %v1177_v0  ;;  %s1180_s23 = smov (!%p163_p2), 126   ;;  %903 = vmatprep.mubr.msk.f32.mxu1 (!%p163_p2), %vm309_vm3, %v305_v23  ;;  %vm271_vm4 = vcmask (!%p163_p2), 1039360   ;;  %vm296_vm5 = vcmask (!%p163_p2), 1031168   ;;  %vm322_vm6 = vcmask (!%p163_p2), 1040384  }
   0x8   : > { %207 = vst [vmem:[#allocation2 + $0x10] sm:$0xff] (!%p163_p2), %v1177_v0  ;;  %208 = vst.msk [vmem:[#allocation2 + $0x18] sm:$0xff] (!%p163_p2), %vm205_vm0, %v1177_v0  ;;  %v1181_v60 = vmov (!%p163_p2), 1.0   ;;  %v306_v61 = vld [vmem:[%s1433_s3 + $0x8] sm:$0xff] (!%p163_p2)  ;;  %v307_v62 = vld [vmem:[%s1433_s3 + $0x10] sm:$0xff] (!%p163_p2)  ;;  %vm732_vm9 = vcmask (!%p163_p2), 64512  }
   0x9   : > { %211 = vst [vmem:[#allocation2 + $0x30] sm:$0xff] (!%p163_p2), %v1177_v0  ;;  %212 = vst.msk [vmem:[#allocation2 + $0x38] sm:$0xff] (!%p163_p2), %vm205_vm0, %v1177_v0  ;;  %v308_v63 = vld [vmem:[%s1433_s3 + $0x18] sm:$0xff] (!%p163_p2)  ;;  %v420_v0 = vlaneseq (!%p163_p2) }
   0xd   : > { %s1436_s16 = smov (!%p188_p3, %s792_s16), 1 }
   0xe   : > { %s821_s17 = sshll.u32 %s1436_s16, 5 }
   0xf   : > { %s192_s20 = scalar_lea.vmem %s1432_s2, %s821_s17  ;;  %s197_s30 = scalar_lea.vmem %s1434_s4, %s821_s17 }
  0x10   : > { %v1224_v1 = vld [vmem:[%s192_s20 + $0x10] sm:$0xff]  ;;  %v1226_v2 = vld [vmem:[%s192_s20] sm:$0xff]  ;;  %v1232_v3 = vld [vmem:[%s192_s20 + $0x18] sm:$0xff] }
  0x11   : > { %221 = vrot.lane.b32.xlu1 %v1224_v1, %s1178_s21  ;;  %217 = vrot.lane.b32.xlu0 %v1226_v2, %s1178_s21  ;;  %v1234_v4 = vld [vmem:[%s192_s20 + $0x8] sm:$0xff] }
  0x15   : > { %223 = vrot.lane.b32.xlu1 %v1232_v3, %s1178_s21  ;;  %219 = vrot.lane.b32.xlu0 %v1234_v4, %s1178_s21 }
  0x83   : > { %v222_v5 = vpop.permute.xlu1 %221  ;;  %v218_v6 = vpop.permute.xlu0 %217 }
  0x84   : > { %235 = vst.msk [vmem:[#allocation2 + $0x20] sm:$0xff] %vm229_vm1, %v222_v5  ;;  %230 = vst.msk [vmem:[#allocation2] sm:$0xff] %vm229_vm1, %v218_v6 }
  0x85   : > { %236 = vst.msk [vmem:[#allocation2 + $0x28] sm:$0xff] %vm231_vm2, %v222_v5  ;;  %232 = vst.msk [vmem:[#allocation2 + $0x8] sm:$0xff] %vm231_vm2, %v218_v6  ;;  %v202_v5 = vld [vmem:[%s1430_s0] sm:$0x1]  ;;  %v421_v6 = vshrl.u32 %v420_v0, 7 }
  0x86   : > { %vm203_vm7 = vcmp.gt.f32.partialorder %v202_v5, 0.5 }
  0x87   : > { %v224_v7 = vpop.permute.xlu1 %223  ;;  %v220_v8 = vpop.permute.xlu0 %219 }
  0x88   : > { %237 = vst.msk [vmem:[#allocation2 + $0x30] sm:$0xff] %vm229_vm1, %v224_v7  ;;  %233 = vst.msk [vmem:[#allocation2 + $0x10] sm:$0xff] %vm229_vm1, %v220_v8 }
  0x89   : > { %238 = vst.msk [vmem:[#allocation2 + $0x38] sm:$0xff] %vm231_vm2, %v224_v7  ;;  %234 = vst.msk [vmem:[#allocation2 + $0x18] sm:$0xff] %vm231_vm2, %v220_v8 }
  0x8b   : > { %v239_v9 = vld [vmem:[#allocation2] sm:$0xff] }
  0x8c   : > { %v243_v10 = vld [vmem:[#allocation2 + $0x8] sm:$0xff]  ;;  %v241_v11 = vld [vmem:[#allocation2 + $0x20] sm:$0xff] }
  0x8d   : > { %v1073_v12 = vpack.i.bf16 %v243_v10, %v239_v9  ;;  %v245_v13 = vld [vmem:[#allocation2 + $0x28] sm:$0xff] }
  0x8e   : > { %v1083_v14 = vpack.i.bf16 %v245_v13, %v241_v11 }
  0x8f   : > { %1074 = vrot.lane.b32.xlu0 %v1073_v12, %s1179_s22  ;;  %v240_v15 = vld [vmem:[#allocation2 + $0x10] sm:$0xff] }
  0x90   : > { %v244_v16 = vld [vmem:[#allocation2 + $0x18] sm:$0xff]  ;;  %v979_v18 = vpack.c.bf16 %v240_v15, %v239_v9  ;;  %v242_v19 = vld [vmem:[#allocation2 + $0x30] sm:$0xff]  ;;  %v422_v9 = vsub.s32 0, %v421_v6 }
  0x91   : > { %v1078_v17 = vpack.i.bf16 %v244_v16, %v240_v15  ;;  %v246_v20 = vld [vmem:[#allocation2 + $0x38] sm:$0xff]  ;;  %v983_v22 = vpack.c.bf16 %v242_v19, %v241_v11  ;;  %v1182_v11 = vmov 0  }
  0x92   : > { %v1088_v21 = vpack.i.bf16 %v246_v20, %v242_v19  ;;  %980 = vmatprep.subr.bf16.mxu1 %v979_v18 }
  0x93   : > { %1084 = vrot.lane.b32.xlu0 %v1083_v14, %s1179_s22  ;;  %1079 = vrot.lane.b32.xlu1 %v1078_v17, %s1179_s22 }
  0x94   : > { %982 = vmatpush3.bf16.msra.mxu1 %v979_v18 }
  0x95   : > { %984 = vmatprep.subr.bf16.mxu1 %v983_v22 }
  0x97   : > { %1094 = vrot.lane.b32.xlu0 %v1073_v12, %s1180_s23  ;;  %1089 = vrot.lane.b32.xlu1 %v1088_v21, %s1179_s22  ;;  %v419_v12 = vsel %vm203_vm7, 1, %v1182_v11 }
  0x98   : > { %986 = vmatpush3.bf16.msra.mxu1 %v983_v22 }
  0x9b   : > { %1104 = vrot.lane.b32.xlu0 %v1083_v14, %s1180_s23  ;;  %1099 = vrot.lane.b32.xlu1 %v1078_v17, %s1180_s23  ;;  %v1287_v14 = vrot.slane %v419_v12, %v422_v9 }
  0x9d   : > { %vm424_vm8 = vcmp.eq.s32.totalorder %v1287_v14, 1 }
  0x9f   : > { %1109 = vrot.lane.b32.xlu1 %v1088_v21, %s1180_s23 }
 0x101   : > { %v1075_v24 = vpop.permute.xlu0 %1074 }
 0x102   : > { %v1077_v25 = vunpack.i.h.bf16 %v1075_v24  ;;  %v1076_v26 = vunpack.i.l.bf16 %v1075_v24 }
 0x104   : > { %v272_v33 = vsel %vm271_vm4, %v1076_v26, %v1077_v25 }
 0x105   : > { %v1080_v27 = vpop.permute.xlu1 %1079  ;;  %v1085_v28 = vpop.permute.xlu0 %1084 }
 0x106   : > { %v1082_v29 = vunpack.i.h.bf16 %v1080_v27  ;;  %v1081_v30 = vunpack.i.l.bf16 %v1080_v27  ;;  %v1087_v31 = vunpack.i.h.bf16 %v1085_v28  ;;  %v1086_v32 = vunpack.i.l.bf16 %v1085_v28 }
 0x108   : > { %v273_v34 = vsel %vm271_vm4, %v1081_v30, %v1082_v29  ;;  %v274_v42 = vsel %vm271_vm4, %v1086_v32, %v1087_v31 }
 0x109   : > { %v1090_v35 = vpop.permute.xlu1 %1089  ;;  %v1095_v36 = vpop.permute.xlu0 %1094  ;;  %v987_v37 = vpack.c.bf16 %v273_v34, %v272_v33 }
 0x10a   : > { %v1092_v38 = vunpack.i.h.bf16 %v1090_v35  ;;  %v1091_v39 = vunpack.i.l.bf16 %v1090_v35  ;;  %v1097_v40 = vunpack.i.h.bf16 %v1095_v36  ;;  %v1096_v41 = vunpack.i.l.bf16 %v1095_v36 }
 0x10b   : > { %988 = vmatprep.subr.bf16.mxu1 %v987_v37 }
 0x10c   : > { %990 = vmatpush3.bf16.msra.mxu1 %v987_v37  ;;  %v275_v43 = vsel %vm271_vm4, %v1091_v39, %v1092_v38  ;;  %v297_v51 = vsel %vm296_vm5, %v1096_v41, %v1097_v40  ;;  %v806_v41 = vld [vmem:[%s1433_s3 + $0x20] sm:$0xff] }
 0x10d   : > { %v1100_v44 = vpop.permute.xlu1 %1099  ;;  %v1105_v45 = vpop.permute.xlu0 %1104  ;;  %v991_v46 = vpack.c.bf16 %v275_v43, %v274_v42  ;;  %v631_v42 = vld [vmem:[%s1431_s1] sm:$0xff]  ;;  %v632_v43 = vld [vmem:[%s1431_s1 + $0x8] sm:$0xff] }
 0x10e   : > { %v1102_v47 = vunpack.i.h.bf16 %v1100_v44  ;;  %v1101_v48 = vunpack.i.l.bf16 %v1100_v44  ;;  %v1107_v49 = vunpack.i.h.bf16 %v1105_v45  ;;  %v1106_v50 = vunpack.i.l.bf16 %v1105_v45  ;;  %v633_v44 = vld [vmem:[%s1431_s1 + $0x10] sm:$0xff] }
 0x10f   : > { %992 = vmatprep.subr.bf16.mxu1 %v991_v46  ;;  %v1027_v45 = vpack.c.bf16 %v632_v43, %v631_v42  ;;  %v645_v42 = vld [vmem:[%s1431_s1 + $0x70] sm:$0xff] }
 0x110   : > { %994 = vmatpush3.bf16.msra.mxu1 %v991_v46  ;;  %v298_v52 = vsel %vm296_vm5, %v1101_v48, %v1102_v47  ;;  %v299_v57 = vsel %vm296_vm5, %v1106_v50, %v1107_v49  ;;  %v634_v46 = vld [vmem:[%s1431_s1 + $0x18] sm:$0xff]  ;;  %v635_v48 = vld [vmem:[%s1431_s1 + $0x20] sm:$0xff]  ;;  %v636_v49 = vld [vmem:[%s1431_s1 + $0x28] sm:$0xff] }
 0x111   : > { %v1110_v53 = vpop.permute.xlu1 %1109  ;;  %v995_v54 = vpack.c.bf16 %v298_v52, %v297_v51  ;;  %v1031_v47 = vpack.c.bf16 %v634_v46, %v633_v44  ;;  %1028 = vmatprep.subr.bf16.mxu0 %v1027_v45  ;;  %v1035_v50 = vpack.c.bf16 %v636_v49, %v635_v48  ;;  %v637_v51 = vld [vmem:[%s1431_s1 + $0x30] sm:$0xff]  ;;  %v638_v52 = vld [vmem:[%s1431_s1 + $0x38] sm:$0xff] }
 0x112   : > { %v1112_v55 = vunpack.i.h.bf16 %v1110_v53  ;;  %v1111_v56 = vunpack.i.l.bf16 %v1110_v53  ;;  %1030 = vmatpush3.bf16.msra.mxu0 %v1027_v45  ;;  %v1039_v53 = vpack.c.bf16 %v638_v52, %v637_v51  ;;  %v646_v44 = vld [vmem:[%s1431_s1 + $0x78] sm:$0xff] }
 0x113   : > { %996 = vmatprep.subr.bf16.mxu1 %v995_v54  ;;  %1032 = vmatprep.subr.bf16.mxu0 %v1031_v47  ;;  %v1055_v45 = vpack.c.bf16 %v646_v44, %v645_v42 }
 0x114   : > { %998 = vmatpush3.bf16.msra.mxu1 %v995_v54  ;;  %v300_v58 = vsel %vm296_vm5, %v1111_v56, %v1112_v55 }
 0x115   : > { %v999_v59 = vpack.c.bf16 %v300_v58, %v299_v57 }
 0x116   : > { %1034 = vmatpush3.bf16.msra.mxu0 %v1031_v47 }
 0x117   : > { %1000 = vmatprep.subr.bf16.mxu1 %v999_v59  ;;  %1036 = vmatprep.subr.bf16.mxu0 %v1035_v50 }
 0x118   : > { %1002 = vmatpush3.bf16.msra.mxu1 %v999_v59 }
 0x119   : > { %901 = vmatprep.subr.msk.mxu1 %vm322_vm6, %v1181_v60 }
 0x11a   : > { %1038 = vmatpush3.bf16.msra.mxu0 %v1035_v50 }
 0x11b   : > { %1040 = vmatprep.subr.bf16.mxu0 %v1039_v53 }
 0x11c   : > { %902 = vmatpush3.msk.msra.mxu1 %vm322_vm6, %v1181_v60 }
 0x11d   : > { %904 = vmatmul.mubr.msk.f32.vlgmr.msra.gmra.mrb[0].mxu1 %vm309_vm3, %v306_v61 }
 0x11e   : > { %906 = vmatprep.mubr.msk.f32.mxu1 %vm309_vm3, %v307_v62  ;;  %1042 = vmatpush3.bf16.msra.mxu0 %v1039_v53 }
 0x121   : > { %907 = vmatmul.mubr.msk.f32.gmra.mrb[2].mxu1 %vm309_vm3, %v308_v63 }
 0x122   : > { %935 = vmatprep.mubr.msk.f32.mxu1 %vm309_vm3, %v806_v41  ;;  %v644_v41 = vld [vmem:[%s1431_s1 + $0x68] sm:$0xff] }
 0x1f0   : > { %v905_v7 = vpop.f32.mrb[0].mxu1 }
 0x1f1   : > { %1153 = vtanh.f32 %v905_v7  ;;  %v392_v8 = vpop.f32.mrb[1].mxu1 }
 0x1f2   : > { %1155 = vtanh.f32 %v392_v8 }
 0x1f4   : > { %v908_v10 = vpop.f32.mrb[2].mxu1 }
 0x1f5   : > { %1157 = vtanh.f32 %v908_v10  ;;  %v402_v13 = vpop.f32.mrb[3].mxu1 }
 0x1f6   : > { %1159 = vtanh.f32 %v402_v13 }
 0x1fb   : > { %v1154_v15 = vpop.eup %1153 }
 0x1fc   : > { %v1156_v16 = vpop.eup %1155  ;;  %v416_v17 = vadd.f32 %v1154_v15, %v1234_v4 }
 0x1fd   : > { %v415_v18 = vadd.f32 %v1156_v16, %v1226_v2 }
 0x1fe   : > { %v1294_v19 = vsel %vm424_vm8, %v416_v17, 0.0 }
 0x1ff   : > { %v1158_v20 = vpop.eup %1157  ;;  %435 = vrot.lane.b32.xlu1 %v1294_v19, %s1178_s21  ;;  %v1300_v21 = vsel %vm424_vm8, %v415_v18, 0.0 }
 0x200   : > { %v1160_v22 = vpop.eup %1159  ;;  %433 = vrot.lane.b32.xlu0 %v1300_v21, %s1178_s21  ;;  %v418_v4 = vadd.f32 %v1158_v20, %v1232_v3 }
 0x201   : > { %v417_v2 = vadd.f32 %v1160_v22, %v1224_v1 }
 0x202   : > { %v1308_v23 = vsel %vm424_vm8, %v418_v4, 0.0 }
 0x203   : > { %439 = vrot.lane.b32.xlu1 %v1308_v23, %s1178_s21  ;;  %v1314_v24 = vsel %vm424_vm8, %v417_v2, 0.0 }
 0x204   : > { %437 = vrot.lane.b32.xlu0 %v1314_v24, %s1178_s21 }
 0x271   : > { %v436_v25 = vpop.permute.xlu1 %435 }
 0x272   : > { %447 = vst.msk [vmem:[#allocation2 + $0x10] sm:$0xff] %vm229_vm1, %v436_v25  ;;  %v434_v1 = vpop.permute.xlu0 %433 }
 0x273   : > { %448 = vst.msk [vmem:[#allocation2 + $0x18] sm:$0xff] %vm231_vm2, %v436_v25  ;;  %446 = vst.msk [vmem:[#allocation2 + $0x8] sm:$0xff] %vm231_vm2, %v434_v1 }
 0x274   : > { %445 = vst.msk [vmem:[#allocation2] sm:$0xff] %vm229_vm1, %v434_v1 }
 0x275   : > { %v440_v3 = vpop.permute.xlu1 %439 }
 0x276   : > { %451 = vst.msk [vmem:[#allocation2 + $0x30] sm:$0xff] %vm229_vm1, %v440_v3  ;;  %v438_v26 = vpop.permute.xlu0 %437 }
 0x277   : > { %452 = vst.msk [vmem:[#allocation2 + $0x38] sm:$0xff] %vm231_vm2, %v440_v3  ;;  %450 = vst.msk [vmem:[#allocation2 + $0x28] sm:$0xff] %vm231_vm2, %v438_v26 }
 0x278   : > { %449 = vst.msk [vmem:[#allocation2 + $0x20] sm:$0xff] %vm229_vm1, %v438_v26 }
 0x279   : > { %v454_v27 = vld [vmem:[#allocation2 + $0x10] sm:$0xff] }
 0x27a   : > { %v458_v28 = vld [vmem:[#allocation2 + $0x18] sm:$0xff]  ;;  %v457_v31 = vld [vmem:[#allocation2 + $0x8] sm:$0xff] }
 0x27b   : > { %v1113_v29 = vpack.i.bf16 %v458_v28, %v454_v27  ;;  %v453_v30 = vld [vmem:[#allocation2] sm:$0xff] }
 0x27c   : > { %v1003_v32 = vpack.c.bf16 %v454_v27, %v453_v30  ;;  %v1118_v33 = vpack.i.bf16 %v457_v31, %v453_v30 }
 0x27d   : > { %1114 = vrot.lane.b32.xlu1 %v1113_v29, %s1179_s22  ;;  %v456_v34 = vld [vmem:[#allocation2 + $0x30] sm:$0xff] }
 0x27e   : > { %1004 = vmatprep.subr.bf16.mxu1 %v1003_v32  ;;  %1119 = vrot.lane.b32.xlu0 %v1118_v33, %s1179_s22  ;;  %v460_v35 = vld [vmem:[#allocation2 + $0x38] sm:$0xff]  ;;  %v459_v38 = vld [vmem:[#allocation2 + $0x28] sm:$0xff] }
 0x27f   : > { %1006 = vmatpush3.bf16.msra.mxu1 %v1003_v32  ;;  %v1123_v36 = vpack.i.bf16 %v460_v35, %v456_v34  ;;  %v455_v37 = vld [vmem:[#allocation2 + $0x20] sm:$0xff]  ;;  %v807_v32 = vld [vmem:[%s1433_s3 + $0x28] sm:$0xff] }
 0x280   : > { %v1128_v39 = vpack.i.bf16 %v459_v38, %v455_v37  ;;  %v1007_v40 = vpack.c.bf16 %v456_v34, %v455_v37  ;;  %v809_v34 = vld [vmem:[%s1433_s3 + $0x38] sm:$0xff]  ;;  %v639_v35 = vld [vmem:[%s1431_s1 + $0x40] sm:$0xff] }
 0x281   : > { %1124 = vrot.lane.b32.xlu1 %v1123_v36, %s1179_s22  ;;  %v642_v38 = vld [vmem:[%s1431_s1 + $0x58] sm:$0xff] }
 0x282   : > { %1129 = vrot.lane.b32.xlu0 %v1128_v39, %s1179_s22  ;;  %1008 = vmatprep.subr.bf16.mxu1 %v1007_v40 }
 0x283   : > { %1010 = vmatpush3.bf16.msra.mxu1 %v1007_v40  ;;  %v643_v40 = vld [vmem:[%s1431_s1 + $0x60] sm:$0xff] }
 0x284   : > { %v1051_v43 = vpack.c.bf16 %v644_v41, %v643_v40 }
 0x285   : > { %1139 = vrot.lane.b32.xlu1 %v1113_v29, %s1180_s23 }
 0x286   : > { %1134 = vrot.lane.b32.xlu0 %v1118_v33, %s1180_s23  ;;  %v808_v33 = vld [vmem:[%s1433_s3 + $0x30] sm:$0xff] }
 0x289   : > { %1149 = vrot.lane.b32.xlu1 %v1123_v36, %s1180_s23  ;;  %v640_v36 = vld [vmem:[%s1431_s1 + $0x48] sm:$0xff] }
 0x28a   : > { %1144 = vrot.lane.b32.xlu0 %v1128_v39, %s1180_s23  ;;  %v1043_v37 = vpack.c.bf16 %v640_v36, %v639_v35 }
 0x28c   : > { %1044 = vmatprep.subr.bf16.mxu0 %v1043_v37 }
 0x28d   : > { %1046 = vmatpush3.bf16.msra.mxu0 %v1043_v37 }
 0x2ef   : > { %v1115_v54 = vpop.permute.xlu1 %1114 }
 0x2f0   : > { %v1117_v55 = vunpack.i.h.bf16 %v1115_v54  ;;  %v1116_v56 = vunpack.i.l.bf16 %v1115_v54  ;;  %v1120_v57 = vpop.permute.xlu0 %1119 }
 0x2f1   : > { %v1122_v58 = vunpack.i.h.bf16 %v1120_v57  ;;  %v1121_v59 = vunpack.i.l.bf16 %v1120_v57 }
 0x2f2   : > { %v486_v61 = vsel %vm271_vm4, %v1116_v56, %v1117_v55 }
 0x2f3   : > { %v1125_v62 = vpop.permute.xlu1 %1124  ;;  %v485_v63 = vsel %vm271_vm4, %v1121_v59, %v1122_v58 }
 0x2f4   : > { %v1127_v0 = vunpack.i.h.bf16 %v1125_v62  ;;  %v1126_v5 = vunpack.i.l.bf16 %v1125_v62  ;;  %v1130_v6 = vpop.permute.xlu0 %1129  ;;  %v1011_v7 = vpack.c.bf16 %v486_v61, %v485_v63 }
 0x2f5   : > { %v1132_v8 = vunpack.i.h.bf16 %v1130_v6  ;;  %v1131_v9 = vunpack.i.l.bf16 %v1130_v6 }
 0x2f6   : > { %1012 = vmatprep.subr.bf16.mxu1 %v1011_v7  ;;  %v488_v10 = vsel %vm271_vm4, %v1126_v5, %v1127_v0 }
 0x2f7   : > { %v1140_v11 = vpop.permute.xlu1 %1139  ;;  %1014 = vmatpush3.bf16.msra.mxu1 %v1011_v7  ;;  %v487_v12 = vsel %vm271_vm4, %v1131_v9, %v1132_v8 }
 0x2f8   : > { %v1142_v13 = vunpack.i.h.bf16 %v1140_v11  ;;  %v1141_v15 = vunpack.i.l.bf16 %v1140_v11  ;;  %v1135_v16 = vpop.permute.xlu0 %1134  ;;  %v1015_v17 = vpack.c.bf16 %v488_v10, %v487_v12 }
 0x2f9   : > { %v1137_v18 = vunpack.i.h.bf16 %v1135_v16  ;;  %v1136_v20 = vunpack.i.l.bf16 %v1135_v16 }
 0x2fa   : > { %1016 = vmatprep.subr.bf16.mxu1 %v1015_v17  ;;  %v510_v22 = vsel %vm296_vm5, %v1141_v15, %v1142_v13 }
 0x2fb   : > { %v1150_v4 = vpop.permute.xlu1 %1149  ;;  %1018 = vmatpush3.bf16.msra.mxu1 %v1015_v17  ;;  %v509_v2 = vsel %vm296_vm5, %v1136_v20, %v1137_v18 }
 0x2fc   : > { %v1152_v25 = vunpack.i.h.bf16 %v1150_v4  ;;  %v1151_v1 = vunpack.i.l.bf16 %v1150_v4  ;;  %v1145_v3 = vpop.permute.xlu0 %1144  ;;  %v1019_v26 = vpack.c.bf16 %v510_v22, %v509_v2 }
 0x2fd   : > { %v1147_v27 = vunpack.i.h.bf16 %v1145_v3  ;;  %v1146_v28 = vunpack.i.l.bf16 %v1145_v3 }
 0x2fe   : > { %1020 = vmatprep.subr.bf16.mxu1 %v1019_v26  ;;  %v512_v29 = vsel %vm296_vm5, %v1151_v1, %v1152_v25 }
 0x2ff   : > { %1022 = vmatpush3.bf16.msra.mxu1 %v1019_v26  ;;  %v511_v30 = vsel %vm296_vm5, %v1146_v28, %v1147_v27 }
 0x300   : > { %v1023_v31 = vpack.c.bf16 %v512_v29, %v511_v30 }
 0x302   : > { %1024 = vmatprep.subr.bf16.mxu1 %v1023_v31 }
 0x303   : > { %1026 = vmatpush3.bf16.msra.mxu1 %v1023_v31 }
 0x304   : > { %933 = vmatprep.subr.msk.mxu1 %vm322_vm6, %v1181_v60 }
 0x307   : > { %934 = vmatpush3.msk.msra.mxu1 %vm322_vm6, %v1181_v60  ;;  %v641_v60 = vld [vmem:[%s1431_s1 + $0x50] sm:$0xff] }
 0x308   : > { %936 = vmatmul.mubr.msk.f32.vlgmr.msra.gmra.mrb[4].mxu1 %vm309_vm3, %v807_v32  ;;  %v1047_v39 = vpack.c.bf16 %v642_v38, %v641_v60 }
 0x309   : > { %938 = vmatprep.mubr.msk.f32.mxu1 %vm309_vm3, %v808_v33 }
 0x30a   : > { %1048 = vmatprep.subr.bf16.mxu0 %v1047_v39 }
 0x30b   : > { %1050 = vmatpush3.bf16.msra.mxu0 %v1047_v39 }
 0x30c   : > { %939 = vmatmul.mubr.msk.f32.gmra.mrb[6].mxu1 %vm309_vm3, %v809_v34  ;;  %1052 = vmatprep.subr.bf16.mxu0 %v1051_v43 }
 0x30f   : > { %1054 = vmatpush3.bf16.msra.mxu0 %v1051_v43 }
 0x310   : > { %1056 = vmatprep.subr.bf16.mxu0 %v1055_v45 }
 0x313   : > { %1058 = vmatpush3.bf16.msra.mxu0 %v1055_v45 }
 0x3db   : > { %v937_v46 = vpop.f32.mrb[4].mxu1 }
 0x3dc   : > { %1161 = vtanh.f32 %v937_v46  ;;  %v600_v47 = vpop.f32.mrb[5].mxu1 }
 0x3dd   : > { %1163 = vtanh.f32 %v600_v47 }
 0x3df   : > { %v940_v48 = vpop.f32.mrb[6].mxu1 }
 0x3e0   : > { %1165 = vtanh.f32 %v940_v48  ;;  %v610_v49 = vpop.f32.mrb[7].mxu1 }
 0x3e1   : > { %1167 = vtanh.f32 %v610_v49 }
 0x3e6   : > { %v1162_v50 = vpop.eup %1161 }
 0x3e7   : > { %v1164_v51 = vpop.eup %1163  ;;  %v624_v53 = vadd.f32 %v1162_v50, %v1294_v19 }
 0x3e8   : > { %v623_v52 = vadd.f32 %v1164_v51, %v1300_v21 }
 0x3ea   : > { %v1166_v54 = vpop.eup %1165  ;;  %973 = vmatprep.mubr.msk.f32.mxu0 %vm424_vm8, %v623_v52 }
 0x3eb   : > { %v1168_v55 = vpop.eup %1167  ;;  %974 = vmatmul.mubr.msk.f32.vlgmr.msra.gmra.mrb[0].mxu0 %vm424_vm8, %v624_v53  ;;  %v626_v57 = vadd.f32 %v1166_v54, %v1308_v23 }
 0x3ec   : > { %v625_v56 = vadd.f32 %v1168_v55, %v1314_v24 }
 0x3ee   : > { %976 = vmatprep.mubr.msk.f32.mxu0 %vm424_vm8, %v625_v56 }
 0x3ef   : > { %977 = vmatmul.mubr.msk.f32.gmra.mrb[2].mxu0 %vm424_vm8, %v626_v57 }
 0x4be   : > { %v975_v19 = vpop.f32.mrb[0].mxu0 }
 0x4bf   : > { %734 = vst.msk [vmem:[%s197_s30 + $0x8] sm:$0xff] %vm732_vm9, %v975_v19  ;;  %v713_v21 = vpop.f32.mrb[1].mxu0 }
 0x4c0   : > { %733 = vst.msk [vmem:[%s197_s30] sm:$0xff] %vm732_vm9, %v713_v21 }
 0x4c2   : > { %v978_v58 = vpop.f32.mrb[2].mxu0 }
 0x4c3   : > { %736 = vst.msk [vmem:[%s197_s30 + $0x18] sm:$0xff] %vm732_vm9, %v978_v58  ;;  %v723_v24 = vpop.f32.mrb[3].mxu0 }
 0x4c4   : > { %735 = vst.msk [vmem:[%s197_s30 + $0x10] sm:$0xff] %vm732_vm9, %v723_v24 }
 0x4c5 PF: > { %s14_s15 = sadd.s32 1, %s1175_s15  }
 0x4c6   : > { %p11_p4 = scmp.ge.s32.totalorder %s14_s15, 4  }
 0x4c8   :  { %13 = sbr.rel (!%p11_p4) target bundleno = 1 (0x1), region = 67 }

</bundles_post_ra>
